<compile_context>
chip_gen: v6e
topology: v6e:2x2x1
jax: 0.10.0
libtpu: 0.0.40
codegen_flags: <defaults>
</compile_context>

<pallas_src>
import jax
import jax.numpy as jnp
from jax import lax
from jax.experimental import pallas as pl
from jax.experimental.pallas import tpu as pltpu

LANE = 128


def _round_up(x, m):
    return (x + m - 1) // m * m


def _vmem_capacity_bytes():
    try:
        return int(pltpu.get_tpu_info().vmem_capacity_bytes)
    except Exception:
        return 64 * 1024 * 1024      # conservative fallback (v7x-sized VMEM)


# ---------------- fused Pallas kernel ----------------

def _make_fused_gcn_kernel(tm, tk, cp, m_actual, a_resident):
    """Returns the fused 2-layer-GCN + sum + FC kernel (closure over tiling)."""

    def kernel(a_ref, x_ref, w1_ref, w2_ref, wfc_ref, b1_ref, b2_ref, bfc_ref,
               y_ref, acc_ref, z_ref, h1_ref, colsum_ref):
        layer = pl.program_id(0)          # 0: conv1, 1: conv2 (+ sum/fc epilogue)
        i = pl.program_id(1)              # A_hat row tile
        k = pl.program_id(2)              # A_hat reduction (column) tile
        ni = pl.num_programs(1)
        nk = pl.num_programs(2)

        k_start = pl.multiple_of(k * tk, tk)
        i_start = pl.multiple_of(i * tm, tm)

        # --- stage the dense RHS slab Z[k rows] once per layer (at i == 0) ---
        @pl.when((layer == 0) & (i == 0))
        def _():
            # Z = X @ W1  (X is VMEM-resident; Z computed once, kept resident)
            z_ref[pl.ds(k_start, tk), :] = jnp.dot(
                x_ref[pl.ds(k_start, tk), :], w1_ref[...],
                preferred_element_type=jnp.float32).astype(z_ref.dtype)

        @pl.when((layer == 1) & (i == 0))
        def _():
            # Z = H1 @ W2  (H1 produced by layer 0, still resident in VMEM)
            z_ref[pl.ds(k_start, tk), :] = jnp.dot(
                h1_ref[pl.ds(k_start, tk), :], w2_ref[...],
                preferred_element_type=jnp.float32).astype(z_ref.dtype)

        # --- init accumulators ---
        @pl.when(k == 0)
        def _():
            acc_ref[...] = jnp.zeros_like(acc_ref)

            @pl.when((layer == 0) & (i == 0))
            def _():
                colsum_ref[...] = jnp.zeros_like(colsum_ref)

        # --- MXU: accumulate A_tile @ Z_slab in f32 ---
        if a_resident:
            a_tile = a_ref[pl.ds(i_start, tm), pl.ds(k_start, tk)]
        else:
            a_tile = a_ref[...]
        acc_ref[...] += jnp.dot(a_tile, z_ref[pl.ds(k_start, tk), :],
                                preferred_element_type=jnp.float32)

        # --- finalize a row tile after the last reduction step ---
        @pl.when(k == nk - 1)
        def _():
            @pl.when(layer == 0)
            def _():
                h1 = jnp.maximum(acc_ref[...] + b1_ref[...], 0.0)
                h1_ref[pl.ds(i_start, tm), :] = h1.astype(h1_ref.dtype)

            @pl.when(layer == 1)
            def _():
                h2 = jnp.maximum(acc_ref[...] + b2_ref[...], 0.0)
                # Padded rows would contribute relu(b2); mask them out of the sum.
                rows = i_start + lax.broadcasted_iota(jnp.int32, (tm, cp), 0)
                h2 = jnp.where(rows < m_actual, h2, 0.0)
                colsum_ref[...] += jnp.sum(h2, axis=0, keepdims=True)

                # Fused epilogue on the very last grid step: sum @ Wfc^T + bfc.
                @pl.when(i == ni - 1)
                def _():
                    s = colsum_ref[...].astype(jnp.bfloat16)
                    y_ref[...] = jnp.dot(
                        s, wfc_ref[...],
                        preferred_element_type=jnp.float32) + bfc_ref[...]

    return kernel


# ---------------- wrappers ----------------

def build_normalized_adjacency(edge_index, num_nodes):
    # PyG GCNConv semantics: self-loops + symmetric normalization; A[dst, src].
    # TODO(synk): for large sparse graphs, replace the dense A_hat matmul with a
    # CSR scalar-prefetch gather + segment-sum formulation to avoid O(M^2) cost.
    src, dst = edge_index[0], edge_index[1]
    a = jnp.zeros((num_nodes, num_nodes), jnp.float32).at[dst, src].add(1.0)
    a = a + jnp.eye(num_nodes, dtype=jnp.float32)
    deg = a.sum(axis=1)
    dinv = jnp.where(deg > 0, lax.rsqrt(deg), 0.0)
    return dinv[:, None] * a * dinv[None, :]


def gcn_forward(params, x, edge_index, edge_attr):
    # Per-edge features; GCNConv then infers num_nodes = rows = E (as in the spec).
    x_cat = jnp.concatenate([x[edge_index[0]], x[edge_index[1]], edge_attr], axis=1)
    m, cin = x_cat.shape
    hid = params["w1"].shape[1]
    out = params["w2"].shape[1]

    a_hat = build_normalized_adjacency(edge_index, m)

    # Lane-dense channel padding (all channel dims -> multiples of 128).
    cin_p = _round_up(cin, LANE)
    cp = _round_up(max(hid, out), LANE)

    # Row/column tiling of A_hat: tile >= 128 (lane-dense) and up to 512 rows
    # (per-step overhead / DMA bound loop -> bigger tiles win); pad M to tiles.
    t = min(512, _round_up(m, LANE))
    mp = _round_up(m, t)
    n_tiles = mp // t

    bf = jnp.bfloat16
    a_pad = jnp.zeros((mp, mp), bf).at[:m, :m].set(a_hat.astype(bf))
    x_pad = jnp.zeros((mp, cin_p), bf).at[:m, :cin].set(x_cat.astype(bf))
    w1_p = jnp.zeros((cin_p, cp), bf).at[:cin, :hid].set(params["w1"].astype(bf))
    w2_p = jnp.zeros((cp, cp), bf).at[:hid, :out].set(params["w2"].astype(bf))
    wfc_p = jnp.zeros((cp, cp), bf).at[:out, :out].set(params["w_fc"].T.astype(bf))
    b1_p = jnp.zeros((1, cp), jnp.float32).at[0, :hid].set(params["b1"])
    b2_p = jnp.zeros((1, cp), jnp.float32).at[0, :out].set(params["b2"])
    bfc_p = jnp.zeros((1, cp), jnp.float32).at[0, :out].set(params["b_fc"])

    # ---- explicit VMEM budgeting (v5e/v6e/v7x safe) ----
    vmem_cap = _vmem_capacity_bytes()
    resident_base = (
        2 * mp * cin_p * 2                      # X (resident input, double-buffered)
        + 2 * (cin_p * cp + 2 * cp * cp) * 2    # W1 / W2 / Wfc (resident)
        + 8 * cp * 4                            # biases + output blocks
        + t * cp * 4                            # f32 accumulator
        + 2 * mp * cp * 2                       # resident Z and H1 scratch (bf16)
        + cp * 4                                # column sum
    )
    a_resident_bytes = 2 * mp * mp * 2          # whole A_hat, double-buffered
    a_stream_bytes = 3 * t * t * 2              # 3-deep pipelined A tiles
    a_resident = (resident_base + a_resident_bytes) <= int(0.6 * vmem_cap)
    est_vmem = resident_base + (a_resident_bytes if a_resident else a_stream_bytes)
    vmem_limit = int(min(max(2 * est_vmem + (2 << 20), 16 << 20),
                         int(0.85 * vmem_cap)))
    # TODO(synk): if even the streamed-A footprint (resident Z/H1/X) exceeds the
    # budget for very large graphs, the CSR scalar-prefetch path above is needed.

    if a_resident:
        # Whole A_hat stays in VMEM across both layers (fetched once).
        a_spec = pl.BlockSpec((mp, mp), lambda l, i, k: (0, 0))
    else:
        # Stream A tiles with extra pipeline depth to cover Z-staging steps.
        a_spec = pl.BlockSpec((t, t), lambda l, i, k: (i, k),
                              pipeline_mode=pl.Buffered(3))

    kernel = _make_fused_gcn_kernel(tm=t, tk=t, cp=cp, m_actual=m,
                                    a_resident=a_resident)

    y_pad = pl.pallas_call(
        kernel,
        out_shape=jax.ShapeDtypeStruct((1, cp), jnp.float32),
        grid_spec=pltpu.PrefetchScalarGridSpec(
            num_scalar_prefetch=0,
            grid=(2, n_tiles, n_tiles),      # (layer, A row tile, A reduction tile)
            in_specs=[
                a_spec,                                             # A_hat
                pl.BlockSpec((mp, cin_p), lambda l, i, k: (0, 0)),  # X (resident)
                pl.BlockSpec((cin_p, cp), lambda l, i, k: (0, 0)),  # W1 (resident)
                pl.BlockSpec((cp, cp), lambda l, i, k: (0, 0)),     # W2 (resident)
                pl.BlockSpec((cp, cp), lambda l, i, k: (0, 0)),     # Wfc^T (resident)
                pl.BlockSpec((1, cp), lambda l, i, k: (0, 0)),      # b1
                pl.BlockSpec((1, cp), lambda l, i, k: (0, 0)),      # b2
                pl.BlockSpec((1, cp), lambda l, i, k: (0, 0)),      # bfc
            ],
            out_specs=pl.BlockSpec((1, cp), lambda l, i, k: (0, 0)),
            scratch_shapes=[
                pltpu.VMEM((t, cp), jnp.float32),     # acc: sum_k A_tile @ Z_slab
                pltpu.VMEM((mp, cp), jnp.bfloat16),   # Z = X@W1 / H1@W2 (resident)
                pltpu.VMEM((mp, cp), jnp.bfloat16),   # H1 (layer-0 output, resident)
                pltpu.VMEM((1, cp), jnp.float32),     # column-sum of H2
            ],
        ),
        # NOTE: h1/z/colsum scratch is carried across BOTH the layer and row-tile
        # axes, so every grid axis must stay "arbitrary" (strictly sequential).
        # TODO(synk): a v7x two-TensorCore split (core_map + VMEM_SHARED H1 +
        # cross-core colsum combine) needs a restructure; single-core here.
        compiler_params=pltpu.CompilerParams(
            dimension_semantics=("arbitrary", "arbitrary", "arbitrary"),
            vmem_limit_bytes=vmem_limit,
        ),
    )(a_pad, x_pad, w1_p, w2_p, wfc_p, b1_p, b2_p, bfc_p)

    return y_pad[0, :out]


def gcn_reference(params, x, edge_index, edge_attr):
    # Pure-JAX f32 reference of the same math for a correctness check.
    x_cat = jnp.concatenate([x[edge_index[0]], x[edge_index[1]], edge_attr], axis=1)
    a_hat = build_normalized_adjacency(edge_index, x_cat.shape[0])
    h = jnp.maximum(a_hat @ (x_cat @ params["w1"]) + params["b1"], 0.0)
    h = jnp.maximum(a_hat @ (h @ params["w2"]) + params["b2"], 0.0)
    s = h.sum(axis=0)
    return s @ params["w_fc"].T + params["b_fc"]


if __name__ == "__main__":
    key = jax.random.PRNGKey(0)
    N, F, E, Fe = 8, 4, 16, 4                 # nodes, node feats, edges, edge feats
    in_channels = 2 * F + Fe                  # = 12, post-cat per-edge feature dim
    hidden_channels = 16
    out_channels = 8

    ks = jax.random.split(key, 9)
    x = jax.random.normal(ks[0], (N, F), jnp.float32)
    edge_index = jax.random.randint(ks[1], (2, E), 0, N, dtype=jnp.int32)
    edge_attr = jax.random.normal(ks[2], (E, Fe), jnp.float32)

    params = {
        # GCNConv1: weight [in, hidden], bias [hidden]
        "w1": 0.1 * jax.random.normal(ks[3], (in_channels, hidden_channels), jnp.float32),
        "b1": 0.1 * jax.random.normal(ks[4], (hidden_channels,), jnp.float32),
        # GCNConv2: weight [hidden, out], bias [out]
        "w2": 0.1 * jax.random.normal(ks[5], (hidden_channels, out_channels), jnp.float32),
        "b2": 0.1 * jax.random.normal(ks[6], (out_channels,), jnp.float32),
        # nn.Linear(out, out): PyTorch stores [out_features, in_features]
        "w_fc": 0.1 * jax.random.normal(ks[7], (out_channels, out_channels), jnp.float32),
        "b_fc": 0.1 * jax.random.normal(ks[8], (out_channels,), jnp.float32),
    }

    y = jax.jit(gcn_forward)(params, x, edge_index, edge_attr)
    jax.block_until_ready(y)

    y_ref = gcn_reference(params, x, edge_index, edge_attr)
    assert y.shape == (out_channels,)
    # bf16 MXU operands with f32 accumulation -> slightly looser tolerance.
    assert jnp.allclose(y, y_ref, atol=2e-2, rtol=2e-2)

    print("KERNEL_OK")
</pallas_src>

<mosaic_0001>
module attributes {stable_mosaic.version = 11 : i64} {
  func.func private @main(%arg0: i32) attributes {dimension_semantics = [#tpu.dimension_semantics<core_parallel>], iteration_bounds = array<i64: 2>, tpu.core_type = #tpu.core_type<sc_scalar_subcore>, window_params = []} {
    return
  }
}

module attributes {stable_mosaic.version = 11 : i64} {
  func.func private @main(%arg0: i32) attributes {dimension_semantics = [#tpu.dimension_semantics<core_parallel>], iteration_bounds = array<i64: 2>, tpu.core_type = #tpu.core_type<sc_scalar_subcore>, window_params = []} {
    return
  }
}

module attributes {stable_mosaic.version = 11 : i64} {
  func.func @kernel(%arg0: i32, %arg1: i32, %arg2: i32, %arg3: memref<128x128xbf16, #tpu.memory_space<vmem>>, %arg4: memref<128x128xbf16, #tpu.memory_space<vmem>>, %arg5: memref<128x128xbf16, #tpu.memory_space<vmem>>, %arg6: memref<128x128xbf16, #tpu.memory_space<vmem>>, %arg7: memref<128x128xbf16, #tpu.memory_space<vmem>>, %arg8: memref<1x128xf32, #tpu.memory_space<vmem>>, %arg9: memref<1x128xf32, #tpu.memory_space<vmem>>, %arg10: memref<1x128xf32, #tpu.memory_space<vmem>>, %arg11: memref<1x128xf32, #tpu.memory_space<vmem>>, %arg12: memref<128x128xf32, #tpu.memory_space<vmem>>, %arg13: memref<128x128xbf16, #tpu.memory_space<vmem>>, %arg14: memref<128x128xbf16, #tpu.memory_space<vmem>>, %arg15: memref<1x128xf32, #tpu.memory_space<vmem>>) attributes {dimension_semantics = [#tpu.dimension_semantics<arbitrary>, #tpu.dimension_semantics<arbitrary>, #tpu.dimension_semantics<arbitrary>], iteration_bounds = array<i64: 2, 1, 1>, scalar_prefetch = 0 : i64, scratch_operands = 4 : i64, tpu.core_type = #tpu.core_type<tc>, window_params = [{pipeline_mode = #tpu.pipeline_mode<synchronous>, transform_indices = @transform_0, window_bounds = array<i64: 128, 128>}, {pipeline_mode = #tpu.pipeline_mode<synchronous>, transform_indices = @transform_1, window_bounds = array<i64: 128, 128>}, {pipeline_mode = #tpu.pipeline_mode<synchronous>, transform_indices = @transform_2, window_bounds = array<i64: 128, 128>}, {pipeline_mode = #tpu.pipeline_mode<synchronous>, transform_indices = @transform_3, window_bounds = array<i64: 128, 128>}, {pipeline_mode = #tpu.pipeline_mode<synchronous>, transform_indices = @transform_4, window_bounds = array<i64: 128, 128>}, {pipeline_mode = #tpu.pipeline_mode<synchronous>, transform_indices = @transform_5, window_bounds = array<i64: 1, 128>}, {pipeline_mode = #tpu.pipeline_mode<synchronous>, transform_indices = @transform_6, window_bounds = array<i64: 1, 128>}, {pipeline_mode = #tpu.pipeline_mode<synchronous>, transform_indices = @transform_7, window_bounds = array<i64: 1, 128>}, {pipeline_mode = #tpu.pipeline_mode<synchronous>, transform_indices = @transform_8, window_bounds = array<i64: 1, 128>}]} {
    %c128_i32 = arith.constant 128 : i32
    %0 = arith.muli %arg2, %c128_i32 : i32
    %1 = tpu.assume_multiple %0, 128 : i32
    %c128_i32_0 = arith.constant 128 : i32
    %2 = arith.muli %arg1, %c128_i32_0 : i32
    %3 = tpu.assume_multiple %2, 128 : i32
    %c0_i32 = arith.constant 0 : i32
    %4 = arith.cmpi eq, %arg0, %c0_i32 : i32
    %c0_i32_1 = arith.constant 0 : i32
    %5 = arith.cmpi eq, %arg1, %c0_i32_1 : i32
    %6 = arith.andi %4, %5 : i1
    %7 = arith.extui %6 : i1 to i32
    %c0_i32_2 = arith.constant 0 : i32
    %8 = arith.cmpi ne, %7, %c0_i32_2 : i32
    scf.if %8 {
      %29 = arith.index_cast %1 : i32 to index
      %c0_13 = arith.constant 0 : index
      %30 = vector.load %arg4[%29, %c0_13] : memref<128x128xbf16, #tpu.memory_space<vmem>>, vector<128x128xbf16>
      %c0_14 = arith.constant 0 : index
      %c0_15 = arith.constant 0 : index
      %31 = vector.load %arg5[%c0_14, %c0_15] : memref<128x128xbf16, #tpu.memory_space<vmem>>, vector<128x128xbf16>
      %cst_16 = arith.constant dense<0.000000e+00> : vector<128x128xf32>
      %32 = tpu.matmul %30, %31, %cst_16 {dimension_numbers = #tpu.dot_dimension_numbers<[1], [0], [0], [1], [0, 0, 1, 1], [], []>} : vector<128x128xbf16>, vector<128x128xbf16>, vector<128x128xf32> -> vector<128x128xf32>
      %33 = arith.truncf %32 : vector<128x128xf32> to vector<128x128xbf16>
      %34 = arith.index_cast %1 : i32 to index
      %c0_17 = arith.constant 0 : index
      %35 = vector.load %arg13[%34, %c0_17] : memref<128x128xbf16, #tpu.memory_space<vmem>>, vector<128x128xbf16>
      tpu.vector_store %arg13[%34, %c0_17], %33 {strides = array<i32>} : memref<128x128xbf16, #tpu.memory_space<vmem>>, vector<128x128xbf16>,
    } else {
    }
    %c1_i32 = arith.constant 1 : i32
    %9 = arith.cmpi eq, %arg0, %c1_i32 : i32
    %c0_i32_3 = arith.constant 0 : i32
    %10 = arith.cmpi eq, %arg1, %c0_i32_3 : i32
    %11 = arith.andi %9, %10 : i1
    %12 = arith.extui %11 : i1 to i32
    %c0_i32_4 = arith.constant 0 : i32
    %13 = arith.cmpi ne, %12, %c0_i32_4 : i32
    scf.if %13 {
      %29 = arith.index_cast %1 : i32 to index
      %c0_13 = arith.constant 0 : index
      %30 = vector.load %arg14[%29, %c0_13] : memref<128x128xbf16, #tpu.memory_space<vmem>>, vector<128x128xbf16>
      %c0_14 = arith.constant 0 : index
      %c0_15 = arith.constant 0 : index
      %31 = vector.load %arg6[%c0_14, %c0_15] : memref<128x128xbf16, #tpu.memory_space<vmem>>, vector<128x128xbf16>
      %cst_16 = arith.constant dense<0.000000e+00> : vector<128x128xf32>
      %32 = tpu.matmul %30, %31, %cst_16 {dimension_numbers = #tpu.dot_dimension_numbers<[1], [0], [0], [1], [0, 0, 1, 1], [], []>} : vector<128x128xbf16>, vector<128x128xbf16>, vector<128x128xf32> -> vector<128x128xf32>
      %33 = arith.truncf %32 : vector<128x128xf32> to vector<128x128xbf16>
      %34 = arith.index_cast %1 : i32 to index
      %c0_17 = arith.constant 0 : index
      %35 = vector.load %arg13[%34, %c0_17] : memref<128x128xbf16, #tpu.memory_space<vmem>>, vector<128x128xbf16>
      tpu.vector_store %arg13[%34, %c0_17], %33 {strides = array<i32>} : memref<128x128xbf16, #tpu.memory_space<vmem>>, vector<128x128xbf16>,
    } else {
    }
    %c0_i32_5 = arith.constant 0 : i32
    %14 = arith.cmpi eq, %arg2, %c0_i32_5 : i32
    %15 = arith.extui %14 : i1 to i32
    %c0_i32_6 = arith.constant 0 : i32
    %16 = arith.cmpi ne, %15, %c0_i32_6 : i32
    scf.if %16 {
      %cst_13 = arith.constant 0.000000e+00 : f32
      %29 = vector.broadcast %cst_13 : f32 to vector<128x128xf32>
      %c0_14 = arith.constant 0 : index
      %c0_15 = arith.constant 0 : index
      %30 = vector.load %arg12[%c0_14, %c0_15] : memref<128x128xf32, #tpu.memory_space<vmem>>, vector<128x128xf32>
      tpu.vector_store %arg12[%c0_14, %c0_15], %29 {strides = array<i32>} : memref<128x128xf32, #tpu.memory_space<vmem>>, vector<128x128xf32>,
      %c0_i32_16 = arith.constant 0 : i32
      %31 = arith.cmpi eq, %arg0, %c0_i32_16 : i32
      %c0_i32_17 = arith.constant 0 : i32
      %32 = arith.cmpi eq, %arg1, %c0_i32_17 : i32
      %33 = arith.andi %31, %32 : i1
      %34 = arith.extui %33 : i1 to i32
      %c0_i32_18 = arith.constant 0 : i32
      %35 = arith.cmpi ne, %34, %c0_i32_18 : i32
      scf.if %35 {
        %cst_19 = arith.constant 0.000000e+00 : f32
        %36 = vector.broadcast %cst_19 : f32 to vector<1x128xf32>
        %c0_20 = arith.constant 0 : index
        %c0_21 = arith.constant 0 : index
        %37 = vector.load %arg15[%c0_20, %c0_21] : memref<1x128xf32, #tpu.memory_space<vmem>>, vector<1x128xf32>
        tpu.vector_store %arg15[%c0_20, %c0_21], %36 {strides = array<i32>} : memref<1x128xf32, #tpu.memory_space<vmem>>, vector<1x128xf32>,
      } else {
      }
    } else {
    }
    %17 = arith.index_cast %3 : i32 to index
    %18 = arith.index_cast %1 : i32 to index
    %19 = vector.load %arg3[%17, %18] : memref<128x128xbf16, #tpu.memory_space<vmem>>, vector<128x128xbf16>
    %c0 = arith.constant 0 : index
    %c0_7 = arith.constant 0 : index
    %20 = vector.load %arg12[%c0, %c0_7] : memref<128x128xf32, #tpu.memory_space<vmem>>, vector<128x128xf32>
    %21 = arith.index_cast %1 : i32 to index
    %c0_8 = arith.constant 0 : index
    %22 = vector.load %arg13[%21, %c0_8] : memref<128x128xbf16, #tpu.memory_space<vmem>>, vector<128x128xbf16>
    %cst = arith.constant dense<0.000000e+00> : vector<128x128xf32>
    %23 = tpu.matmul %19, %22, %cst {dimension_numbers = #tpu.dot_dimension_numbers<[1], [0], [0], [1], [0, 0, 1, 1], [], []>} : vector<128x128xbf16>, vector<128x128xbf16>, vector<128x128xf32> -> vector<128x128xf32>
    %24 = arith.addf %20, %23 : vector<128x128xf32>
    %c0_9 = arith.constant 0 : index
    %c0_10 = arith.constant 0 : index
    %25 = vector.load %arg12[%c0_9, %c0_10] : memref<128x128xf32, #tpu.memory_space<vmem>>, vector<128x128xf32>
    tpu.vector_store %arg12[%c0_9, %c0_10], %24 {strides = array<i32>} : memref<128x128xf32, #tpu.memory_space<vmem>>, vector<128x128xf32>,
    %c0_i32_11 = arith.constant 0 : i32
    %26 = arith.cmpi eq, %arg2, %c0_i32_11 : i32
    %27 = arith.extui %26 : i1 to i32
    %c0_i32_12 = arith.constant 0 : i32
    %28 = arith.cmpi ne, %27, %c0_i32_12 : i32
    scf.if %28 {
      %c0_i32_13 = arith.constant 0 : i32
      %29 = arith.cmpi eq, %arg0, %c0_i32_13 : i32
      %30 = arith.extui %29 : i1 to i32
      %c0_i32_14 = arith.constant 0 : i32
      %31 = arith.cmpi ne, %30, %c0_i32_14 : i32
      scf.if %31 {
        %c0_17 = arith.constant 0 : index
        %c0_18 = arith.constant 0 : index
        %35 = vector.load %arg12[%c0_17, %c0_18] : memref<128x128xf32, #tpu.memory_space<vmem>>, vector<128x128xf32>
        %c0_19 = arith.constant 0 : index
        %c0_20 = arith.constant 0 : index
        %36 = vector.load %arg8[%c0_19, %c0_20] : memref<1x128xf32, #tpu.memory_space<vmem>>, vector<1x128xf32>
        %37 = vector.broadcast %36 : vector<1x128xf32> to vector<128x128xf32>
        %38 = arith.addf %35, %37 : vector<128x128xf32>
        %cst_21 = arith.constant 0.000000e+00 : f32
        %39 = vector.broadcast %cst_21 : f32 to vector<128x128xf32>
        %40 = arith.maximumf %38, %39 : vector<128x128xf32>
        %41 = arith.truncf %40 : vector<128x128xf32> to vector<128x128xbf16>
        %42 = arith.index_cast %3 : i32 to index
        %c0_22 = arith.constant 0 : index
        %43 = vector.load %arg14[%42, %c0_22] : memref<128x128xbf16, #tpu.memory_space<vmem>>, vector<128x128xbf16>
        tpu.vector_store %arg14[%42, %c0_22], %41 {strides = array<i32>} : memref<128x128xbf16, #tpu.memory_space<vmem>>, vector<128x128xbf16>,
      } else {
      }
      %c1_i32_15 = arith.constant 1 : i32
      %32 = arith.cmpi eq, %arg0, %c1_i32_15 : i32
      %33 = arith.extui %32 : i1 to i32
      %c0_i32_16 = arith.constant 0 : i32
      %34 = arith.cmpi ne, %33, %c0_i32_16 : i32
      scf.if %34 {
        %c0_17 = arith.constant 0 : index
        %c0_18 = arith.constant 0 : index
        %35 = vector.load %arg12[%c0_17, %c0_18] : memref<128x128xf32, #tpu.memory_space<vmem>>, vector<128x128xf32>
        %c0_19 = arith.constant 0 : index
        %c0_20 = arith.constant 0 : index
        %36 = vector.load %arg9[%c0_19, %c0_20] : memref<1x128xf32, #tpu.memory_space<vmem>>, vector<1x128xf32>
        %37 = vector.broadcast %36 : vector<1x128xf32> to vector<128x128xf32>
        %38 = arith.addf %35, %37 : vector<128x128xf32>
        %cst_21 = arith.constant 0.000000e+00 : f32
        %39 = vector.broadcast %cst_21 : f32 to vector<128x128xf32>
        %40 = arith.maximumf %38, %39 : vector<128x128xf32>
        %41 = tpu.iota {dimensions = array<i32: 0>} : vector<128x128xi32>
        %42 = vector.broadcast %3 : i32 to vector<128x128xi32>
        %43 = arith.addi %42, %41 : vector<128x128xi32>
        %c16_i32 = arith.constant 16 : i32
        %44 = vector.broadcast %c16_i32 : i32 to vector<128x128xi32>
        %45 = arith.cmpi slt, %43, %44 : vector<128x128xi32>
        %cst_22 = arith.constant 0.000000e+00 : f32
        %46 = vector.broadcast %cst_22 : f32 to vector<128x128xf32>
        %47 = arith.select %45, %40, %46 : vector<128x128xi1>, vector<128x128xf32>
        %c0_23 = arith.constant 0 : index
        %c0_24 = arith.constant 0 : index
        %48 = vector.load %arg15[%c0_23, %c0_24] : memref<1x128xf32, #tpu.memory_space<vmem>>, vector<1x128xf32>
        %cst_25 = arith.constant dense<0.000000e+00> : vector<128xf32>
        %49 = vector.multi_reduction <add>, %47, %cst_25 [0] : vector<128x128xf32> to vector<128xf32>
        %50 = vector.shape_cast %49 : vector<128xf32> to vector<1x128xf32>
        %51 = arith.addf %48, %50 : vector<1x128xf32>
        %c0_26 = arith.constant 0 : index
        %c0_27 = arith.constant 0 : index
        %52 = vector.load %arg15[%c0_26, %c0_27] : memref<1x128xf32, #tpu.memory_space<vmem>>, vector<1x128xf32>
        tpu.vector_store %arg15[%c0_26, %c0_27], %51 {strides = array<i32>} : memref<1x128xf32, #tpu.memory_space<vmem>>, vector<1x128xf32>,
        %c0_i32_28 = arith.constant 0 : i32
        %53 = arith.cmpi eq, %arg1, %c0_i32_28 : i32
        %54 = arith.extui %53 : i1 to i32
        %c0_i32_29 = arith.constant 0 : i32
        %55 = arith.cmpi ne, %54, %c0_i32_29 : i32
        scf.if %55 {
          %c0_30 = arith.constant 0 : index
          %c0_31 = arith.constant 0 : index
          %56 = vector.load %arg15[%c0_30, %c0_31] : memref<1x128xf32, #tpu.memory_space<vmem>>, vector<1x128xf32>
          %57 = arith.truncf %56 : vector<1x128xf32> to vector<1x128xbf16>
          %c0_32 = arith.constant 0 : index
          %c0_33 = arith.constant 0 : index
          %58 = vector.load %arg7[%c0_32, %c0_33] : memref<128x128xbf16, #tpu.memory_space<vmem>>, vector<128x128xbf16>
          %cst_34 = arith.constant dense<0.000000e+00> : vector<1x128xf32>
          %59 = tpu.matmul %57, %58, %cst_34 {dimension_numbers = #tpu.dot_dimension_numbers<[1], [0], [0], [1], [0, 0, 1, 1], [], []>} : vector<1x128xbf16>, vector<128x128xbf16>, vector<1x128xf32> -> vector<1x128xf32>
          %c0_35 = arith.constant 0 : index
          %c0_36 = arith.constant 0 : index
          %60 = vector.load %arg10[%c0_35, %c0_36] : memref<1x128xf32, #tpu.memory_space<vmem>>, vector<1x128xf32>
          %61 = arith.addf %59, %60 : vector<1x128xf32>
          %c0_37 = arith.constant 0 : index
          %c0_38 = arith.constant 0 : index
          %62 = vector.load %arg11[%c0_37, %c0_38] : memref<1x128xf32, #tpu.memory_space<vmem>>, vector<1x128xf32>
          tpu.vector_store %arg11[%c0_37, %c0_38], %61 {strides = array<i32>} : memref<1x128xf32, #tpu.memory_space<vmem>>, vector<1x128xf32>,
        } else {
        }
      } else {
      }
    } else {
    }
    return
  }
  func.func @transform_0(%arg0: i32, %arg1: i32, %arg2: i32) -> (i32, i32) {
    %c0_i32 = arith.constant 0 : i32
    %c0_i32_0 = arith.constant 0 : i32
    %c0_i32_1 = arith.constant 0 : i32
    return %c0_i32, %c0_i32_0 : i32, i32
  }
  func.func @transform_1(%arg0: i32, %arg1: i32, %arg2: i32) -> (i32, i32) {
    %c0_i32 = arith.constant 0 : i32
    %c0_i32_0 = arith.constant 0 : i32
    %c0_i32_1 = arith.constant 0 : i32
    return %c0_i32, %c0_i32_0 : i32, i32
  }
  func.func @transform_2(%arg0: i32, %arg1: i32, %arg2: i32) -> (i32, i32) {
    %c0_i32 = arith.constant 0 : i32
    %c0_i32_0 = arith.constant 0 : i32
    %c0_i32_1 = arith.constant 0 : i32
    return %c0_i32, %c0_i32_0 : i32, i32
  }
  func.func @transform_3(%arg0: i32, %arg1: i32, %arg2: i32) -> (i32, i32) {
    %c0_i32 = arith.constant 0 : i32
    %c0_i32_0 = arith.constant 0 : i32
    %c0_i32_1 = arith.constant 0 : i32
    return %c0_i32, %c0_i32_0 : i32, i32
  }
  func.func @transform_4(%arg0: i32, %arg1: i32, %arg2: i32) -> (i32, i32) {
    %c0_i32 = arith.constant 0 : i32
    %c0_i32_0 = arith.constant 0 : i32
    %c0_i32_1 = arith.constant 0 : i32
    return %c0_i32, %c0_i32_0 : i32, i32
  }
  func.func @transform_5(%arg0: i32, %arg1: i32, %arg2: i32) -> (i32, i32) {
    %c0_i32 = arith.constant 0 : i32
    %c0_i32_0 = arith.constant 0 : i32
    %c0_i32_1 = arith.constant 0 : i32
    return %c0_i32, %c0_i32_0 : i32, i32
  }
  func.func @transform_6(%arg0: i32, %arg1: i32, %arg2: i32) -> (i32, i32) {
    %c0_i32 = arith.constant 0 : i32
    %c0_i32_0 = arith.constant 0 : i32
    %c0_i32_1 = arith.constant 0 : i32
    return %c0_i32, %c0_i32_0 : i32, i32
  }
  func.func @transform_7(%arg0: i32, %arg1: i32, %arg2: i32) -> (i32, i32) {
    %c0_i32 = arith.constant 0 : i32
    %c0_i32_0 = arith.constant 0 : i32
    %c0_i32_1 = arith.constant 0 : i32
    return %c0_i32, %c0_i32_0 : i32, i32
  }
  func.func @transform_8(%arg0: i32, %arg1: i32, %arg2: i32) -> (i32, i32) {
    %c0_i32 = arith.constant 0 : i32
    %c0_i32_0 = arith.constant 0 : i32
    %c0_i32_1 = arith.constant 0 : i32
    return %c0_i32, %c0_i32_0 : i32, i32
  }
}

</mosaic_0001>

<bundles_post_ra>
// kernel: gcn_forward.1
= control target key start
LH: loop header
LB: loop body
LE: loop exit
PB: predicated region body
PF: predicated region fallthrough
CT: control target
= control target key end

     0   :  { %s2361_s27 = smov 0   ;;  %s2363_s28 = smov 0   ;;  %s2530_s0 = inlined_call_operand.vmem [shape: bf16[128,128], index: 0, kind: input, shape index: {}]   ;;  %s2531_s1 = inlined_call_operand.vmem [shape: bf16[128,128], index: 1, kind: input, shape index: {}]   ;;  %s2532_s2 = inlined_call_operand.vmem [shape: bf16[128,128], index: 2, kind: input, shape index: {}]   ;;  %s2533_s3 = inlined_call_operand.vmem [shape: bf16[128,128], index: 3, kind: input, shape index: {}]   ;;  %s2534_s4 = inlined_call_operand.vmem [shape: bf16[128,128], index: 4, kind: input, shape index: {}]   ;;  %s2535_s5 = inlined_call_operand.vmem [shape: f32[1,128], index: 5, kind: input, shape index: {}]   ;;  %s2536_s6 = inlined_call_operand.vmem [shape: f32[1,128], index: 6, kind: input, shape index: {}]   ;;  %s2537_s7 = inlined_call_operand.vmem [shape: f32[1,128], index: 7, kind: input, shape index: {}]   ;;  %s2538_s8 = inlined_call_operand.vmem [shape: f32[1,128], index: 8, kind: output, shape index: {}]  }
   0x1   :  { %s2365_s29 = smov 0  }
   0x2 LB: > { %s37_s30 = sadd.s32 1, %s2306_s28  ;;  %p1679_p0 = scmp.ge.s32.totalorder %s2310_s29, 1  ;;  %s2310_s29 = sphi %s2365_s29, %s18_s29   ;;  %s2306_s28 = sphi %s2363_s28, %s2540_s28   ;;  %s2302_s27 = sphi %s2361_s27, %s2539_s27  }
   0x3   : > { %p39_p1 = scmp.ge.s32.totalorder %s37_s30, 2  ;;  %p266_p2 = scmp.lt.s32.totalorder %s2310_s29, 3 }
   0x5   : > { %s2542_s30 = smov (%p39_p1, %s37_s30), 0  ;;  %p267_p3 = pnand %p1679_p0, %p266_p2 }
   0x6   : > { %p293_p4 = scmp.eq.s32.totalorder (!%p267_p3), %s2302_s27, 0 }
   0x7   : > { %270 = sbr.rel (%p267_p3) target bundleno = 1007 (0x3ef), region = 52 }
   0xc   : > { %298 = sbr.rel (!%p293_p4) target bundleno = 255 (0xff), region = 56  ;;  %v2232_v0 = vld [vmem:[%s2532_s2 + $0x38] sm:$0xff] (%p293_p4)   ;;  %v2233_v1 = vld [vmem:[%s2532_s2 + $0x30] sm:$0xff] (%p293_p4)   ;;  %v2234_v2 = vld [vmem:[%s2532_s2 + $0x28] sm:$0xff] (%p293_p4)  }
   0xd   : > { %2040 = vmatprep.subr.bf16.mxu0 (%p293_p4), %v2232_v0  ;;  %2156 = vmatprep.subr.bf16.mxu1 (%p293_p4), %v2232_v0  ;;  %v2235_v3 = vld [vmem:[%s2532_s2 + $0x20] sm:$0xff] (%p293_p4)   ;;  %v2236_v6 = vld [vmem:[%s2532_s2 + $0x18] sm:$0xff] (%p293_p4)   ;;  %v2237_v7 = vld [vmem:[%s2532_s2 + $0x10] sm:$0xff] (%p293_p4)  }
   0xe   : > { %2041 = vmatpush3.bf16.msra.mxu0 (%p293_p4), %v2232_v0  ;;  %2164 = vmatpush3.bf16.msra.mxu1 (%p293_p4), %v2232_v0  ;;  %v2240_v4 = vld [vmem:[%s2531_s1] sm:$0xff] (%p293_p4)   ;;  %v2238_v8 = vld [vmem:[%s2532_s2 + $0x8] sm:$0xff] (%p293_p4)   ;;  %v2244_v12 = vld [vmem:[%s2531_s1 + $0x10] sm:$0xff] (%p293_p4)  }
   0xf   : > { %2042 = vmatprep.subr.bf16.mxu0 (%p293_p4), %v2233_v1  ;;  %2157 = vmatprep.subr.bf16.mxu1 (%p293_p4), %v2233_v1  ;;  %v2241_v5 = vld [vmem:[%s2531_s1 + $0x20] sm:$0xff] (%p293_p4)   ;;  %v2242_v10 = vld [vmem:[%s2531_s1 + $0x8] sm:$0xff] (%p293_p4)   ;;  %v2245_v13 = vld [vmem:[%s2531_s1 + $0x30] sm:$0xff] (%p293_p4)  }
  0x10   : > { %2056 = vmatprep.mubr.bf16.mxu0 (%p293_p4), %v2240_v4  ;;  %2064 = vmatprep.mubr.bf16.mxu1 (%p293_p4), %v2241_v5  ;;  %v2239_v9 = vld [vmem:[%s2532_s2] sm:$0xff] (%p293_p4)   ;;  %v2243_v11 = vld [vmem:[%s2531_s1 + $0x28] sm:$0xff] (%p293_p4)   ;;  %v2246_v14 = vld [vmem:[%s2531_s1 + $0x18] sm:$0xff] (%p293_p4)  }
  0x11   : > { %v2247_v15 = vld [vmem:[%s2531_s1 + $0x38] sm:$0xff]  }
  0x12   : > { %2043 = vmatpush3.bf16.msra.mxu0 %v2233_v1  ;;  %2165 = vmatpush3.bf16.msra.mxu1 %v2233_v1 }
  0x13   : > { %2044 = vmatprep.subr.bf16.mxu0 %v2234_v2  ;;  %2158 = vmatprep.subr.bf16.mxu1 %v2234_v2 }
  0x16   : > { %2045 = vmatpush3.bf16.msra.mxu0 %v2234_v2  ;;  %2166 = vmatpush3.bf16.msra.mxu1 %v2234_v2 }
  0x17   : > { %2046 = vmatprep.subr.bf16.mxu0 %v2235_v3  ;;  %2159 = vmatprep.subr.bf16.mxu1 %v2235_v3 }
  0x1a   : > { %2047 = vmatpush3.bf16.msra.mxu0 %v2235_v3  ;;  %2167 = vmatpush3.bf16.msra.mxu1 %v2235_v3 }
  0x1b   : > { %2048 = vmatprep.subr.bf16.mxu0 %v2236_v6  ;;  %2160 = vmatprep.subr.bf16.mxu1 %v2236_v6 }
  0x1e   : > { %2049 = vmatpush3.bf16.msra.mxu0 %v2236_v6  ;;  %2168 = vmatpush3.bf16.msra.mxu1 %v2236_v6 }
  0x1f   : > { %2050 = vmatprep.subr.bf16.mxu0 %v2237_v7  ;;  %2161 = vmatprep.subr.bf16.mxu1 %v2237_v7 }
  0x22   : > { %2051 = vmatpush3.bf16.msra.mxu0 %v2237_v7  ;;  %2169 = vmatpush3.bf16.msra.mxu1 %v2237_v7 }
  0x23   : > { %2052 = vmatprep.subr.bf16.mxu0 %v2238_v8  ;;  %2162 = vmatprep.subr.bf16.mxu1 %v2238_v8 }
  0x26   : > { %2053 = vmatpush3.bf16.msra.mxu0 %v2238_v8  ;;  %2170 = vmatpush3.bf16.msra.mxu1 %v2238_v8 }
  0x27   : > { %2054 = vmatprep.subr.bf16.mxu0 %v2239_v9  ;;  %2163 = vmatprep.subr.bf16.mxu1 %v2239_v9 }
  0x2a   : > { %2055 = vmatpush3.bf16.msra.mxu0 %v2239_v9  ;;  %2171 = vmatpush3.bf16.msra.mxu1 %v2239_v9 }
  0x2d   : > { %2057 = vmatmul.mubr.bf16.vlgmr.msra.gmra.mxu0 %v2242_v10  ;;  %2065 = vmatmul.mubr.bf16.vlgmr.msra.gmra.mxu1 %v2243_v11 }
  0x2e   : > { %2060 = vmatprep.mubr.bf16.mxu0 %v2244_v12  ;;  %2068 = vmatprep.mubr.bf16.mxu1 %v2245_v13 }
  0x35   : > { %2061 = vmatmul.mubr.bf16.gmra.mxu0 %v2246_v14  ;;  %2069 = vmatmul.mubr.bf16.gmra.mxu1 %v2247_v15 }
  0xed   : > { %v2058_v16 = vpop.f32.mrf.mxu0  ;;  %v2066_v17 = vpop.f32.mrf.mxu1 }
  0xef   : > { %v465_v18 = vpop.f32.mrf.mxu0  ;;  %v497_v19 = vpop.f32.mrf.mxu1 }
  0xf1   : > { %v2059_v20 = vpop.f32.mrf.mxu0  ;;  %v2067_v21 = vpop.f32.mrf.mxu1 }
  0xf2   : > { %v1850_v22 = vpack.c.bf16 %v2059_v20, %v2058_v16  ;;  %v1870_v23 = vpack.c.bf16 %v2067_v21, %v2066_v17 }
  0xf3   : > { %v468_v24 = vpop.f32.mrf.mxu0  ;;  %v500_v25 = vpop.f32.mrf.mxu1 }
  0xf4   : > { %1962 = vst [vmem:[#allocation3 + $0x8] sm:$0xff] %v1850_v22   ;;  %1966 = vst [vmem:[#allocation3 + $0x28] sm:$0xff] %v1870_v23   ;;  %v1845_v26 = vpack.c.bf16 %v468_v24, %v465_v18  ;;  %v1865_v27 = vpack.c.bf16 %v500_v25, %v497_v19 }
  0xf5   : > { %v2062_v28 = vpop.f32.mrf.mxu0  ;;  %v2070_v29 = vpop.f32.mrf.mxu1 }
  0xf6   : > { %1846 = vst [vmem:[#allocation3] sm:$0xff] %v1845_v26   ;;  %1965 = vst [vmem:[#allocation3 + $0x20] sm:$0xff] %v1865_v27  }
  0xf7   : > { %v481_v30 = vpop.f32.mrf.mxu0  ;;  %v513_v31 = vpop.f32.mrf.mxu1 }
  0xf9   : > { %v2063_v32 = vpop.f32.mrf.mxu0  ;;  %v2071_v33 = vpop.f32.mrf.mxu1 }
  0xfa   : > { %v1860_v34 = vpack.c.bf16 %v2063_v32, %v2062_v28  ;;  %v1880_v35 = vpack.c.bf16 %v2071_v33, %v2070_v29 }
  0xfb   : > { %v484_v36 = vpop.f32.mrf.mxu0  ;;  %v516_v37 = vpop.f32.mrf.mxu1 }
  0xfc   : > { %1964 = vst [vmem:[#allocation3 + $0x18] sm:$0xff] %v1860_v34   ;;  %1968 = vst [vmem:[#allocation3 + $0x38] sm:$0xff] %v1880_v35   ;;  %v1855_v38 = vpack.c.bf16 %v484_v36, %v481_v30  ;;  %v1875_v39 = vpack.c.bf16 %v516_v37, %v513_v31 }
  0xfe   : > { %1963 = vst [vmem:[#allocation3 + $0x10] sm:$0xff] %v1855_v38   ;;  %1967 = vst [vmem:[#allocation3 + $0x30] sm:$0xff] %v1875_v39  }
  0xff PF: > { %p610_p5 = scmp.eq.s32.totalorder %s2302_s27, 1 }
 0x100   : > { %v2248_v40 = vld [vmem:[%s2533_s3 + $0x38] sm:$0xff] (%p610_p5)   ;;  %v2249_v41 = vld [vmem:[%s2533_s3 + $0x30] sm:$0xff] (%p610_p5)   ;;  %v2250_v42 = vld [vmem:[%s2533_s3 + $0x28] sm:$0xff] (%p610_p5)  }
 0x101   : > { %614 = sbr.rel (!%p610_p5) target bundleno = 499 (0x1f3), region = 60  ;;  %2072 = vmatprep.subr.bf16.mxu0 (%p610_p5), %v2248_v40  ;;  %2172 = vmatprep.subr.bf16.mxu1 (%p610_p5), %v2248_v40  ;;  %v2251_v43 = vld [vmem:[%s2533_s3 + $0x20] sm:$0xff] (%p610_p5)   ;;  %v2252_v46 = vld [vmem:[%s2533_s3 + $0x18] sm:$0xff] (%p610_p5)   ;;  %v2253_v47 = vld [vmem:[%s2533_s3 + $0x10] sm:$0xff] (%p610_p5)  }
 0x102   : > { %2073 = vmatpush3.bf16.msra.mxu0 (%p610_p5), %v2248_v40  ;;  %2180 = vmatpush3.bf16.msra.mxu1 (%p610_p5), %v2248_v40  ;;  %v2256_v44 = vld [vmem:[#allocation4] sm:$0xff] (%p610_p5)   ;;  %v2254_v48 = vld [vmem:[%s2533_s3 + $0x8] sm:$0xff] (%p610_p5)   ;;  %v2260_v52 = vld [vmem:[#allocation4 + $0x10] sm:$0xff] (%p610_p5)  }
 0x103   : > { %2074 = vmatprep.subr.bf16.mxu0 (%p610_p5), %v2249_v41  ;;  %2173 = vmatprep.subr.bf16.mxu1 (%p610_p5), %v2249_v41  ;;  %v2257_v45 = vld [vmem:[#allocation4 + $0x20] sm:$0xff] (%p610_p5)   ;;  %v2258_v50 = vld [vmem:[#allocation4 + $0x8] sm:$0xff] (%p610_p5)   ;;  %v2261_v53 = vld [vmem:[#allocation4 + $0x30] sm:$0xff] (%p610_p5)  }
 0x104   : > { %2088 = vmatprep.mubr.bf16.mxu0 (%p610_p5), %v2256_v44  ;;  %2096 = vmatprep.mubr.bf16.mxu1 (%p610_p5), %v2257_v45  ;;  %v2255_v49 = vld [vmem:[%s2533_s3] sm:$0xff] (%p610_p5)   ;;  %v2259_v51 = vld [vmem:[#allocation4 + $0x28] sm:$0xff] (%p610_p5)   ;;  %v2262_v54 = vld [vmem:[#allocation4 + $0x18] sm:$0xff] (%p610_p5)  }
 0x105   : > { %v2263_v55 = vld [vmem:[#allocation4 + $0x38] sm:$0xff] (%p610_p5)  }
 0x106   : > { %2075 = vmatpush3.bf16.msra.mxu0 %v2249_v41  ;;  %2181 = vmatpush3.bf16.msra.mxu1 %v2249_v41 }
 0x107   : > { %2076 = vmatprep.subr.bf16.mxu0 %v2250_v42  ;;  %2174 = vmatprep.subr.bf16.mxu1 %v2250_v42 }
 0x10a   : > { %2077 = vmatpush3.bf16.msra.mxu0 %v2250_v42  ;;  %2182 = vmatpush3.bf16.msra.mxu1 %v2250_v42 }
 0x10b   : > { %2078 = vmatprep.subr.bf16.mxu0 %v2251_v43  ;;  %2175 = vmatprep.subr.bf16.mxu1 %v2251_v43 }
 0x10e   : > { %2079 = vmatpush3.bf16.msra.mxu0 %v2251_v43  ;;  %2183 = vmatpush3.bf16.msra.mxu1 %v2251_v43 }
 0x10f   : > { %2080 = vmatprep.subr.bf16.mxu0 %v2252_v46  ;;  %2176 = vmatprep.subr.bf16.mxu1 %v2252_v46 }
 0x112   : > { %2081 = vmatpush3.bf16.msra.mxu0 %v2252_v46  ;;  %2184 = vmatpush3.bf16.msra.mxu1 %v2252_v46 }
 0x113   : > { %2082 = vmatprep.subr.bf16.mxu0 %v2253_v47  ;;  %2177 = vmatprep.subr.bf16.mxu1 %v2253_v47 }
 0x116   : > { %2083 = vmatpush3.bf16.msra.mxu0 %v2253_v47  ;;  %2185 = vmatpush3.bf16.msra.mxu1 %v2253_v47 }
 0x117   : > { %2084 = vmatprep.subr.bf16.mxu0 %v2254_v48  ;;  %2178 = vmatprep.subr.bf16.mxu1 %v2254_v48 }
 0x11a   : > { %2085 = vmatpush3.bf16.msra.mxu0 %v2254_v48  ;;  %2186 = vmatpush3.bf16.msra.mxu1 %v2254_v48 }
 0x11b   : > { %2086 = vmatprep.subr.bf16.mxu0 %v2255_v49  ;;  %2179 = vmatprep.subr.bf16.mxu1 %v2255_v49 }
 0x11e   : > { %2087 = vmatpush3.bf16.msra.mxu0 %v2255_v49  ;;  %2187 = vmatpush3.bf16.msra.mxu1 %v2255_v49 }
 0x121   : > { %2089 = vmatmul.mubr.bf16.vlgmr.msra.gmra.mxu0 %v2258_v50  ;;  %2097 = vmatmul.mubr.bf16.vlgmr.msra.gmra.mxu1 %v2259_v51 }
 0x122   : > { %2092 = vmatprep.mubr.bf16.mxu0 %v2260_v52  ;;  %2100 = vmatprep.mubr.bf16.mxu1 %v2261_v53 }
 0x129   : > { %2093 = vmatmul.mubr.bf16.gmra.mxu0 %v2262_v54  ;;  %2101 = vmatmul.mubr.bf16.gmra.mxu1 %v2263_v55 }
 0x1e1   : > { %v2090_v56 = vpop.f32.mrf.mxu0  ;;  %v2098_v57 = vpop.f32.mrf.mxu1 }
 0x1e3   : > { %v781_v58 = vpop.f32.mrf.mxu0  ;;  %v813_v59 = vpop.f32.mrf.mxu1 }
 0x1e5   : > { %v2091_v60 = vpop.f32.mrf.mxu0  ;;  %v2099_v61 = vpop.f32.mrf.mxu1 }
 0x1e6   : > { %v1890_v62 = vpack.c.bf16 %v2091_v60, %v2090_v56  ;;  %v1910_v63 = vpack.c.bf16 %v2099_v61, %v2098_v57 }
 0x1e7   : > { %v784_v0 = vpop.f32.mrf.mxu0  ;;  %v816_v1 = vpop.f32.mrf.mxu1 }
 0x1e8   : > { %1969 = vst [vmem:[#allocation3 + $0x8] sm:$0xff] %v1890_v62   ;;  %1973 = vst [vmem:[#allocation3 + $0x28] sm:$0xff] %v1910_v63   ;;  %v1885_v2 = vpack.c.bf16 %v784_v0, %v781_v58  ;;  %v1905_v3 = vpack.c.bf16 %v816_v1, %v813_v59 }
 0x1e9   : > { %v2094_v4 = vpop.f32.mrf.mxu0  ;;  %v2102_v5 = vpop.f32.mrf.mxu1 }
 0x1ea   : > { %1886 = vst [vmem:[#allocation3] sm:$0xff] %v1885_v2   ;;  %1972 = vst [vmem:[#allocation3 + $0x20] sm:$0xff] %v1905_v3  }
 0x1eb   : > { %v797_v6 = vpop.f32.mrf.mxu0  ;;  %v829_v7 = vpop.f32.mrf.mxu1 }
 0x1ed   : > { %v2095_v8 = vpop.f32.mrf.mxu0  ;;  %v2103_v9 = vpop.f32.mrf.mxu1 }
 0x1ee   : > { %v1900_v10 = vpack.c.bf16 %v2095_v8, %v2094_v4  ;;  %v1920_v11 = vpack.c.bf16 %v2103_v9, %v2102_v5 }
 0x1ef   : > { %v800_v12 = vpop.f32.mrf.mxu0  ;;  %v832_v13 = vpop.f32.mrf.mxu1 }
 0x1f0   : > { %1971 = vst [vmem:[#allocation3 + $0x18] sm:$0xff] %v1900_v10   ;;  %1975 = vst [vmem:[#allocation3 + $0x38] sm:$0xff] %v1920_v11   ;;  %v1895_v14 = vpack.c.bf16 %v800_v12, %v797_v6  ;;  %v1915_v15 = vpack.c.bf16 %v832_v13, %v829_v7 }
 0x1f2   : > { %1970 = vst [vmem:[#allocation3 + $0x10] sm:$0xff] %v1895_v14   ;;  %1974 = vst [vmem:[#allocation3 + $0x30] sm:$0xff] %v1915_v15  }
 0x1f3 PF: > { %v2312_v16 = vmov 0.0   ;;  %v2313_v17 = vmov (%p293_p4), 0.0  }
 0x1f4   : > { %930 = vst [vmem:[#allocation2 + $0x30] sm:$0xff] %v2312_v16  ;;  %931 = vst [vmem:[#allocation2] sm:$0xff] %v2312_v16 }
 0x1f5   : > { %932 = vst [vmem:[#allocation2 + $0x58] sm:$0xff] %v2312_v16  ;;  %933 = vst [vmem:[#allocation2 + $0x18] sm:$0xff] %v2312_v16 }
 0x1f6   : > { %934 = vst [vmem:[#allocation2 + $0x50] sm:$0xff] %v2312_v16  ;;  %935 = vst [vmem:[#allocation2 + $0x68] sm:$0xff] %v2312_v16 }
 0x1f7   : > { %936 = vst [vmem:[#allocation2 + $0x8] sm:$0xff] %v2312_v16  ;;  %937 = vst [vmem:[#allocation2 + $0x48] sm:$0xff] %v2312_v16  ;;  %947 = sbr.rel (!%p293_p4) target bundleno = 509 (0x1fd), region = 68 }
 0x1f8   : > { %938 = vst [vmem:[#allocation2 + $0x40] sm:$0xff] %v2312_v16  ;;  %939 = vst [vmem:[#allocation2 + $0x20] sm:$0xff] %v2312_v16 }
 0x1f9   : > { %940 = vst [vmem:[#allocation2 + $0x10] sm:$0xff] %v2312_v16  ;;  %941 = vst [vmem:[#allocation2 + $0x38] sm:$0xff] %v2312_v16 }
 0x1fa   : > { %942 = vst [vmem:[#allocation2 + $0x60] sm:$0xff] %v2312_v16  ;;  %943 = vst [vmem:[#allocation2 + $0x70] sm:$0xff] %v2312_v16 }
 0x1fb   : > { %944 = vst [vmem:[#allocation2 + $0x78] sm:$0xff] %v2312_v16  ;;  %945 = vst [vmem:[#allocation2 + $0x28] sm:$0xff] %v2312_v16 }
 0x1fc   : > { %948 = vst [vmem:[#allocation5] sm:$0x1] %v2313_v17 }
 0x1fd PF: > { %v2264_v18 = vld [vmem:[#allocation3 + $0x38] sm:$0xff]   ;;  %v2265_v19 = vld [vmem:[#allocation3 + $0x30] sm:$0xff]   ;;  %v2266_v20 = vld [vmem:[#allocation3 + $0x28] sm:$0xff]   ;;  %p1762_p6 = scmp.ne.s32.totalorder %s2302_s27, 0 }
 0x1fe   : > { %2104 = vmatprep.subr.bf16.mxu0 %v2264_v18  ;;  %2188 = vmatprep.subr.bf16.mxu1 %v2264_v18  ;;  %v2267_v21 = vld [vmem:[#allocation3 + $0x20] sm:$0xff]   ;;  %v2268_v24 = vld [vmem:[#allocation3 + $0x18] sm:$0xff]   ;;  %v2269_v25 = vld [vmem:[#allocation3 + $0x10] sm:$0xff]  }
 0x1ff   : > { %2105 = vmatpush3.bf16.msra.mxu0 %v2264_v18  ;;  %2196 = vmatpush3.bf16.msra.mxu1 %v2264_v18  ;;  %v2272_v22 = vld [vmem:[%s2530_s0] sm:$0xff]   ;;  %v2270_v26 = vld [vmem:[#allocation3 + $0x8] sm:$0xff]   ;;  %v2276_v30 = vld [vmem:[%s2530_s0 + $0x10] sm:$0xff]  }
 0x200   : > { %2106 = vmatprep.subr.bf16.mxu0 %v2265_v19  ;;  %2189 = vmatprep.subr.bf16.mxu1 %v2265_v19  ;;  %v2273_v23 = vld [vmem:[%s2530_s0 + $0x20] sm:$0xff]   ;;  %v2274_v28 = vld [vmem:[%s2530_s0 + $0x8] sm:$0xff]   ;;  %v2277_v31 = vld [vmem:[%s2530_s0 + $0x30] sm:$0xff]  }
 0x201   : > { %2120 = vmatprep.mubr.bf16.mxu0 %v2272_v22  ;;  %2128 = vmatprep.mubr.bf16.mxu1 %v2273_v23  ;;  %v2271_v27 = vld [vmem:[#allocation3] sm:$0xff]   ;;  %v2275_v29 = vld [vmem:[%s2530_s0 + $0x28] sm:$0xff]   ;;  %v2278_v32 = vld [vmem:[%s2530_s0 + $0x18] sm:$0xff]  }
 0x202   : > { %v2279_v33 = vld [vmem:[%s2530_s0 + $0x38] sm:$0xff]   ;;  %v982_v35 = vld [vmem:[#allocation2 + $0x10] sm:$0xff]  ;;  %v980_v39 = vld [vmem:[#allocation2 + $0x40] sm:$0xff] }
 0x203   : > { %2107 = vmatpush3.bf16.msra.mxu0 %v2265_v19  ;;  %2197 = vmatpush3.bf16.msra.mxu1 %v2265_v19  ;;  %v974_v34 = vld [vmem:[#allocation2 + $0x58] sm:$0xff]  ;;  %v972_v38 = vld [vmem:[#allocation2 + $0x30] sm:$0xff]  ;;  %v973_v50 = vld [vmem:[#allocation2] sm:$0xff] }
 0x204   : > { %2108 = vmatprep.subr.bf16.mxu0 %v2266_v20  ;;  %2190 = vmatprep.subr.bf16.mxu1 %v2266_v20  ;;  %v975_v44 = vld [vmem:[#allocation2 + $0x18] sm:$0xff]  ;;  %v981_v51 = vld [vmem:[#allocation2 + $0x20] sm:$0xff]  ;;  %v978_v56 = vld [vmem:[#allocation2 + $0x8] sm:$0xff] }
 0x205   : > { %v983_v45 = vld [vmem:[#allocation2 + $0x38] sm:$0xff]  ;;  %v976_v62 = vld [vmem:[#allocation2 + $0x50] sm:$0xff]  ;;  %v984_v63 = vld [vmem:[#allocation2 + $0x60] sm:$0xff] }
 0x206   : > { %v986_v57 = vld [vmem:[#allocation2 + $0x78] sm:$0xff]  ;;  %v979_v4 = vld [vmem:[#allocation2 + $0x48] sm:$0xff]  ;;  %v985_v11 = vld [vmem:[#allocation2 + $0x70] sm:$0xff] }
 0x207   : > { %2109 = vmatpush3.bf16.msra.mxu0 %v2266_v20  ;;  %2198 = vmatpush3.bf16.msra.mxu1 %v2266_v20  ;;  %v987_v5 = vld [vmem:[#allocation2 + $0x28] sm:$0xff] }
 0x208   : > { %2110 = vmatprep.subr.bf16.mxu0 %v2267_v21  ;;  %2191 = vmatprep.subr.bf16.mxu1 %v2267_v21  ;;  %v977_v10 = vld [vmem:[#allocation2 + $0x68] sm:$0xff] }
 0x20b   : > { %2111 = vmatpush3.bf16.msra.mxu0 %v2267_v21  ;;  %2199 = vmatpush3.bf16.msra.mxu1 %v2267_v21 }
 0x20c   : > { %2112 = vmatprep.subr.bf16.mxu0 %v2268_v24  ;;  %2192 = vmatprep.subr.bf16.mxu1 %v2268_v24 }
 0x20f   : > { %2113 = vmatpush3.bf16.msra.mxu0 %v2268_v24  ;;  %2200 = vmatpush3.bf16.msra.mxu1 %v2268_v24 }
 0x210   : > { %2114 = vmatprep.subr.bf16.mxu0 %v2269_v25  ;;  %2193 = vmatprep.subr.bf16.mxu1 %v2269_v25 }
 0x213   : > { %2115 = vmatpush3.bf16.msra.mxu0 %v2269_v25  ;;  %2201 = vmatpush3.bf16.msra.mxu1 %v2269_v25 }
 0x214   : > { %2116 = vmatprep.subr.bf16.mxu0 %v2270_v26  ;;  %2194 = vmatprep.subr.bf16.mxu1 %v2270_v26 }
 0x217   : > { %2117 = vmatpush3.bf16.msra.mxu0 %v2270_v26  ;;  %2202 = vmatpush3.bf16.msra.mxu1 %v2270_v26 }
 0x218   : > { %2118 = vmatprep.subr.bf16.mxu0 %v2271_v27  ;;  %2195 = vmatprep.subr.bf16.mxu1 %v2271_v27 }
 0x21b   : > { %2119 = vmatpush3.bf16.msra.mxu0 %v2271_v27  ;;  %2203 = vmatpush3.bf16.msra.mxu1 %v2271_v27 }
 0x21e   : > { %2121 = vmatmul.mubr.bf16.vlgmr.msra.gmra.mxu0 %v2274_v28  ;;  %2129 = vmatmul.mubr.bf16.vlgmr.msra.gmra.mxu1 %v2275_v29 }
 0x21f   : > { %2124 = vmatprep.mubr.bf16.mxu0 %v2276_v30  ;;  %2132 = vmatprep.mubr.bf16.mxu1 %v2277_v31 }
 0x226   : > { %2125 = vmatmul.mubr.bf16.gmra.mxu0 %v2278_v32  ;;  %2133 = vmatmul.mubr.bf16.gmra.mxu1 %v2279_v33 }
 0x2de   : > { %v2122_v36 = vpop.f32.mrf.mxu0  ;;  %v2130_v37 = vpop.f32.mrf.mxu1 }
 0x2df   : > { %v1203_v40 = vadd.f32 %v2122_v36, %v974_v34  ;;  %v1211_v41 = vadd.f32 %v2130_v37, %v982_v35 }
 0x2e0   : > { %v1138_v42 = vpop.f32.mrf.mxu0  ;;  %v1170_v43 = vpop.f32.mrf.mxu1 }
 0x2e1   : > { %1219 = vst [vmem:[#allocation2 + $0x58] sm:$0xff] %v1203_v40  ;;  %1227 = vst [vmem:[#allocation2 + $0x10] sm:$0xff] %v1211_v41  ;;  %v1201_v46 = vadd.f32 %v1138_v42, %v972_v38  ;;  %v1209_v47 = vadd.f32 %v1170_v43, %v980_v39 }
 0x2e2   : > { %v2123_v48 = vpop.f32.mrf.mxu0  ;;  %v2131_v49 = vpop.f32.mrf.mxu1 }
 0x2e3   : > { %1217 = vst [vmem:[#allocation2 + $0x30] sm:$0xff] %v1201_v46  ;;  %1225 = vst [vmem:[#allocation2 + $0x40] sm:$0xff] %v1209_v47  ;;  %v1204_v52 = vadd.f32 %v2123_v48, %v975_v44  ;;  %v1212_v53 = vadd.f32 %v2131_v49, %v983_v45 }
 0x2e4   : > { %v1141_v54 = vpop.f32.mrf.mxu0  ;;  %v1173_v55 = vpop.f32.mrf.mxu1 }
 0x2e5   : > { %1220 = vst [vmem:[#allocation2 + $0x18] sm:$0xff] %v1204_v52  ;;  %1228 = vst [vmem:[#allocation2 + $0x38] sm:$0xff] %v1212_v53  ;;  %v1202_v58 = vadd.f32 %v1141_v54, %v973_v50  ;;  %v1210_v59 = vadd.f32 %v1173_v55, %v981_v51 }
 0x2e6   : > { %v2126_v60 = vpop.f32.mrf.mxu0  ;;  %v2134_v61 = vpop.f32.mrf.mxu1 }
 0x2e7   : > { %1218 = vst [vmem:[#allocation2] sm:$0xff] %v1202_v58  ;;  %1226 = vst [vmem:[#allocation2 + $0x20] sm:$0xff] %v1210_v59  ;;  %v1207_v0 = vadd.f32 %v2126_v60, %v978_v56  ;;  %v1215_v1 = vadd.f32 %v2134_v61, %v986_v57 }
 0x2e8   : > { %v1154_v2 = vpop.f32.mrf.mxu0  ;;  %v1186_v3 = vpop.f32.mrf.mxu1 }
 0x2e9   : > { %1223 = vst [vmem:[#allocation2 + $0x8] sm:$0xff] %v1207_v0  ;;  %1231 = vst [vmem:[#allocation2 + $0x78] sm:$0xff] %v1215_v1  ;;  %v1205_v6 = vadd.f32 %v1154_v2, %v976_v62  ;;  %v1213_v7 = vadd.f32 %v1186_v3, %v984_v63 }
 0x2ea   : > { %v2127_v8 = vpop.f32.mrf.mxu0  ;;  %v2135_v9 = vpop.f32.mrf.mxu1 }
 0x2eb   : > { %1221 = vst [vmem:[#allocation2 + $0x50] sm:$0xff] %v1205_v6  ;;  %1229 = vst [vmem:[#allocation2 + $0x60] sm:$0xff] %v1213_v7  ;;  %v1208_v12 = vadd.f32 %v2127_v8, %v979_v4  ;;  %v1216_v13 = vadd.f32 %v2135_v9, %v987_v5  ;;  %1238 = sbr.rel (%p1762_p6) target bundleno = 768 (0x300), region = 76 }
 0x2ec   : > { %v1157_v14 = vpop.f32.mrf.mxu0  ;;  %v1189_v15 = vpop.f32.mrf.mxu1 }
 0x2ed   : > { %1224 = vst [vmem:[#allocation2 + $0x48] sm:$0xff] %v1208_v12  ;;  %1232 = vst [vmem:[#allocation2 + $0x28] sm:$0xff] %v1216_v13  ;;  %v1206_v16 = vadd.f32 %v1157_v14, %v977_v10  ;;  %v1214_v17 = vadd.f32 %v1189_v15, %v985_v11 }
 0x2ef   : > { %1222 = vst [vmem:[#allocation2 + $0x68] sm:$0xff] %v1206_v16  ;;  %1230 = vst [vmem:[#allocation2 + $0x70] sm:$0xff] %v1214_v17 }
 0x2f0   : > { %v1239_v18 = vld [vmem:[#allocation2 + $0x30] sm:$0xff]  ;;  %v1240_v19 = vld [vmem:[#allocation2] sm:$0xff]  ;;  %v1241_v23 = vld [vmem:[#allocation2 + $0x58] sm:$0xff] }
 0x2f1   : > { %v1763_v20 = vld [vmem:[%s2535_s5] ss:$0 sm:$0xff]  ;;  %v1242_v24 = vld [vmem:[#allocation2 + $0x18] sm:$0xff]  ;;  %v1245_v30 = vld [vmem:[#allocation2 + $0x8] sm:$0xff] }
 0x2f2   : > { %v1262_v21 = vadd.f32 %v1763_v20, %v1239_v18  ;;  %v1263_v22 = vadd.f32 %v1763_v20, %v1240_v19  ;;  %v1243_v25 = vld [vmem:[#allocation2 + $0x50] sm:$0xff]  ;;  %v1264_v26 = vadd.f32 %v1763_v20, %v1241_v23  ;;  %v1265_v27 = vadd.f32 %v1763_v20, %v1242_v24  ;;  %v1247_v36 = vld [vmem:[#allocation2 + $0x40] sm:$0xff]  ;;  %v1250_v43 = vld [vmem:[#allocation2 + $0x38] sm:$0xff] }
 0x2f3   : > { %v1266_v29 = vadd.f32 %v1763_v20, %v1243_v25  ;;  %v1268_v35 = vadd.f32 %v1763_v20, %v1245_v30  ;;  %v1248_v37 = vld [vmem:[#allocation2 + $0x20] sm:$0xff]  ;;  %v1249_v38 = vld [vmem:[#allocation2 + $0x10] sm:$0xff]  ;;  %v1270_v48 = vadd.f32 %v1763_v20, %v1247_v36  ;;  %v1253_v54 = vld [vmem:[#allocation2 + $0x78] sm:$0xff]  ;;  %v1273_v58 = vadd.f32 %v1763_v20, %v1250_v43 }
 0x2f4   : > { %v1246_v31 = vld [vmem:[#allocation2 + $0x48] sm:$0xff]  ;;  %v1278_v32 = vmax.f32 %v1262_v21, 0.0  ;;  %v1279_v33 = vmax.f32 %v1263_v22, 0.0  ;;  %v1280_v39 = vmax.f32 %v1264_v26, 0.0  ;;  %v1281_v40 = vmax.f32 %v1265_v27, 0.0  ;;  %v1251_v44 = vld [vmem:[#allocation2 + $0x60] sm:$0xff] }
 0x2f5   : > { %v1282_v41 = vmax.f32 %v1266_v29, 0.0  ;;  %v1269_v42 = vadd.f32 %v1763_v20, %v1246_v31  ;;  %v1284_v47 = vmax.f32 %v1268_v35, 0.0  ;;  %v1271_v52 = vadd.f32 %v1763_v20, %v1248_v37  ;;  %v1254_v55 = vld [vmem:[#allocation2 + $0x28] sm:$0xff] }
 0x2f6   : > { %v1244_v28 = vld [vmem:[#allocation2 + $0x68] sm:$0xff]  ;;  %v1925_v45 = vpack.c.bf16 %v1279_v33, %v1278_v32  ;;  %v1252_v49 = vld [vmem:[#allocation2 + $0x70] sm:$0xff]  ;;  %v1930_v50 = vpack.c.bf16 %v1281_v40, %v1280_v39  ;;  %v1272_v53 = vadd.f32 %v1763_v20, %v1249_v38  ;;  %v1286_v57 = vmax.f32 %v1270_v48, 0.0 }
 0x2f7   : > { %v1267_v34 = vadd.f32 %v1763_v20, %v1244_v28  ;;  %v1285_v51 = vmax.f32 %v1269_v42, 0.0  ;;  %v1274_v59 = vadd.f32 %v1763_v20, %v1251_v44  ;;  %v1287_v61 = vmax.f32 %v1271_v52, 0.0 }
 0x2f8   : > { %1926 = vst [vmem:[#allocation4] sm:$0xff] %v1925_v45   ;;  %1976 = vst [vmem:[#allocation4 + $0x8] sm:$0xff] %v1930_v50   ;;  %v1288_v62 = vmax.f32 %v1272_v53, 0.0  ;;  %v1275_v63 = vadd.f32 %v1763_v20, %v1252_v49  ;;  %v1289_v0 = vmax.f32 %v1273_v58, 0.0  ;;  %v1276_v2 = vadd.f32 %v1763_v20, %v1253_v54 }
 0x2f9   : > { %v1283_v46 = vmax.f32 %v1267_v34, 0.0  ;;  %v1940_v60 = vpack.c.bf16 %v1285_v51, %v1284_v47  ;;  %v1290_v1 = vmax.f32 %v1274_v59, 0.0  ;;  %v1277_v3 = vadd.f32 %v1763_v20, %v1254_v55 }
 0x2fa   : > { %v1945_v4 = vpack.c.bf16 %v1287_v61, %v1286_v57  ;;  %v1291_v5 = vmax.f32 %v1275_v63, 0.0  ;;  %v1950_v6 = vpack.c.bf16 %v1289_v0, %v1288_v62  ;;  %v1292_v7 = vmax.f32 %v1276_v2, 0.0 }
 0x2fb   : > { %v1935_v56 = vpack.c.bf16 %v1283_v46, %v1282_v41  ;;  %1978 = vst [vmem:[#allocation4 + $0x18] sm:$0xff] %v1940_v60   ;;  %v1293_v8 = vmax.f32 %v1277_v3, 0.0 }
 0x2fc   : > { %1979 = vst [vmem:[#allocation4 + $0x20] sm:$0xff] %v1945_v4   ;;  %v1955_v9 = vpack.c.bf16 %v1291_v5, %v1290_v1  ;;  %1980 = vst [vmem:[#allocation4 + $0x28] sm:$0xff] %v1950_v6  }
 0x2fd   : > { %1977 = vst [vmem:[#allocation4 + $0x10] sm:$0xff] %v1935_v56   ;;  %v1960_v10 = vpack.c.bf16 %v1293_v8, %v1292_v7 }
 0x2fe   : > { %1981 = vst [vmem:[#allocation4 + $0x30] sm:$0xff] %v1955_v9  }
 0x2ff   : > { %1982 = vst [vmem:[#allocation4 + $0x38] sm:$0xff] %v1960_v10  }
 0x300 PF: > { %p1780_p7 = scmp.ne.s32.totalorder %s2302_s27, 1 }
 0x302   : > { %1378 = sbr.rel (%p1780_p7) target bundleno = 1007 (0x3ef), region = 80 }
 0x307   : > { %v2280_v11 = vld [vmem:[%s2534_s4 + $0x38] sm:$0xff]   ;;  %v2314_v12 = vmov 0.0   ;;  %v2281_v13 = vld [vmem:[%s2534_s4 + $0x30] sm:$0xff]   ;;  %vm2315_vm0 = vmmov 0   ;;  %v2282_v14 = vld [vmem:[%s2534_s4 + $0x28] sm:$0xff]  }
 0x308   : > { %2136 = vmatprep.subr.bf16.mxu0 %v2314_v12  ;;  %2152 = vmatprep.mubr.msk.bf16.mxu0 %vm2315_vm0, %v2314_v12  ;;  %v1379_v15 = vld [vmem:[#allocation2 + $0x30] sm:$0xff]  ;;  %v1380_v16 = vld [vmem:[#allocation2] sm:$0xff]  ;;  %v2284_v24 = vld [vmem:[%s2534_s4 + $0x18] sm:$0xff]  }
 0x309   : > { %2137 = vmatpush3.bf16.msra.mxu0 %v2280_v11  ;;  %v1781_v17 = vld [vmem:[%s2536_s6] ss:$0 sm:$0xff]  ;;  %v2285_v27 = vld [vmem:[%s2534_s4 + $0x10] sm:$0xff]   ;;  %v2286_v30 = vld [vmem:[%s2534_s4 + $0x8] sm:$0xff]  }
 0x30a   : > { %2138 = vmatprep.subr.bf16.mxu0 %v2314_v12  ;;  %v1402_v18 = vadd.f32 %v1781_v17, %v1379_v15  ;;  %v1403_v19 = vadd.f32 %v1781_v17, %v1380_v16  ;;  %v2283_v20 = vld [vmem:[%s2534_s4 + $0x20] sm:$0xff]  }
 0x30b   : > { %v1500_v32 = vld [vmem:[#allocation5] sm:$0x1] }
 0x30c   : > { %v1418_v21 = vmax.f32 %v1402_v18, 0.0  ;;  %v1419_v22 = vmax.f32 %v1403_v19, 0.0  ;;  %v2287_v34 = vld [vmem:[%s2534_s4] sm:$0xff]  }
 0x30d   : > { %2139 = vmatpush3.bf16.msra.mxu0 %v2281_v13  ;;  %v1545_v38 = vld [vmem:[%s2537_s7] sm:$0x1] }
 0x30e   : > { %2140 = vmatprep.subr.bf16.mxu0 %v2314_v12  ;;  %v1501_v23 = vadd.f32 %v1419_v22, %v1418_v21 }
 0x310   : > { %v1516_v25 = vrot.slane %v1501_v23, 4 }
 0x311   : > { %2141 = vmatpush3.bf16.msra.mxu0 %v2282_v14 }
 0x312   : > { %2142 = vmatprep.subr.bf16.mxu0 %v2314_v12  ;;  %v1517_v26 = vadd.f32 %v1516_v25, %v1501_v23 }
 0x314   : > { %v1518_v28 = vrot.slane %v1517_v26, 2 }
 0x315   : > { %2143 = vmatpush3.bf16.msra.mxu0 %v2283_v20 }
 0x316   : > { %2144 = vmatprep.subr.bf16.mxu0 %v2314_v12  ;;  %v1519_v29 = vadd.f32 %v1518_v28, %v1517_v26 }
 0x318   : > { %v1520_v31 = vrot.slane %v1519_v29, 1 }
 0x319   : > { %2145 = vmatpush3.bf16.msra.mxu0 %v2284_v24 }
 0x31a   : > { %2146 = vmatprep.subr.bf16.mxu0 %v2314_v12  ;;  %v1521_v33 = vadd.f32 %v1520_v31, %v1519_v29 }
 0x31c   : > { %v1522_v35 = vadd.f32 %v1521_v33, %v1500_v32 }
 0x31d   : > { %2147 = vmatpush3.bf16.msra.mxu0 %v2285_v27 }
 0x31e   : > { %2148 = vmatprep.subr.bf16.mxu0 %v2314_v12  ;;  %1523 = vst [vmem:[#allocation5] sm:$0x1] %v1522_v35 }
 0x321   : > { %2149 = vmatpush3.bf16.msra.mxu0 %v2286_v30 }
 0x322   : > { %2150 = vmatprep.subr.bf16.mxu0 %v2314_v12 }
 0x325   : > { %2151 = vmatpush3.bf16.msra.mxu0 %v2287_v34  ;;  %v1527_v36 = vld [vmem:[#allocation5] sm:$0x1] }
 0x326   : > { %v1528_v37 = vpack.c.bf16 %v1527_v36, %v1527_v36 }
 0x328   : > { %2153 = vmatmul.mubr.bf16.vlgmr.msra.gmra.mxu0 %v1528_v37 }
 0x3e8   : > { %v1628_v39 = vpop.f32.mrf.mxu0 }
 0x3e9   : > { %v1629_v40 = vadd.f32 %v1628_v39, %v1545_v38 }
 0x3ea   : > { %v2154_v41 = vpop.f32.mrf.mxu0 }
 0x3eb   : > { %1634 = vst [vmem:[%s2538_s8] sm:$0x1] %v1629_v40 }
 0x3ec   : > { %v1631_v42 = vpop.f32.mrf.mxu0 }
 0x3ee   : > { %v2155_v43 = vpop.f32.mrf.mxu0 }
 0x3ef PF: > { %s18_s29 = sadd.s32 1, %s2310_s29   ;;  %s2539_s27 = smov %s2306_s28 }
 0x3f0   : > { %p15_p8 = scmp.ge.s32.totalorder %s18_s29, 4   ;;  %s2540_s28 = smov %s2542_s30 }
 0x3f2   :  { %17 = sbr.rel (!%p15_p8) target bundleno = 2 (0x2), region = 114 }

</bundles_post_ra>
